<compile_context>
chip_gen: v6e
topology: v6e:2x2x1
jax: 0.10.0
libtpu: 0.0.40
codegen_flags: <defaults>
</compile_context>

<pallas_src>
import jax
import jax.numpy as jnp
from jax import lax
from jax.experimental import pallas as pl
from jax.experimental.pallas import tpu as pltpu

_LANE = 128        # lane width: last-dim tiling unit
_SUBLANE = 8       # sublane width: second-to-last tiling unit
_MAX_TILE_N = 256  # rows per grid step (fits all generations with big margin)


def _round_up(v, m):
    return ((v + m - 1) // m) * m


def _model_kernel(x_ref, wt_ref, b_ref, out_ref):
    """One (TILE_N, D_pad) row tile of the fused linear -> stack -> tanh pipeline.

    x_ref:   (TILE_N, D_pad)     input row tile
    wt_ref:  (D_pad, D_pad)      pre-transposed Linear weight (in, out), grid-resident
    b_ref:   (1, D_pad)          Linear bias
    out_ref: (2, TILE_N, D_pad)  stacked tanh(linear(x)) and tanh(x), lane-dense
    """
    x = x_ref[...]
    # Linear on the MXU. Weight was transposed once in the wrapper, so no
    # in-kernel transpose (XLU pass + extra VMEM tile) is needed.
    y = jnp.dot(
        x,
        wt_ref[...],
        preferred_element_type=jnp.float32,
        precision=lax.Precision.HIGHEST,
    ) + b_ref[...]

    # stack((y, x)) then tanh (VPU/EUP); D_pad % 128 == 0 -> unmasked stores.
    out_ref[0, :, :] = jnp.tanh(y).astype(out_ref.dtype)
    out_ref[1, :, :] = jnp.tanh(x).astype(out_ref.dtype)


def model_forward(x, weight, bias):
    """x: (N, D) f32, weight: (D, D) f32 (out, in), bias: (D,) f32 -> (2, N*D) f32."""
    n, d = x.shape

    d_pad = _round_up(max(d, _LANE), _LANE)
    tile_n = min(_MAX_TILE_N, _round_up(n, _SUBLANE))
    n_pad = _round_up(n, tile_n)

    # Zero-pad to lane/sublane-aligned shapes. Zero weight/bias columns keep the
    # valid region exact; padded rows/cols are sliced off after the kernel.
    x_p = jnp.zeros((n_pad, d_pad), jnp.float32).at[:n, :d].set(x)
    # One-time hoisted transpose: (out, in) -> (in, out) so kernel does x @ Wt.
    wt_p = jnp.zeros((d_pad, d_pad), jnp.float32).at[:d, :d].set(weight.T)
    b_p = jnp.zeros((1, d_pad), jnp.float32).at[0, :d].set(bias)

    grid = (n_pad // tile_n,)

    # VMEM budget: double-buffered x/out blocks + resident weight/bias.
    x_bytes = tile_n * d_pad * 4
    w_bytes = d_pad * d_pad * 4
    b_bytes = _SUBLANE * d_pad * 4
    o_bytes = 2 * tile_n * d_pad * 4
    vmem_limit = int(
        min(max(3 * (x_bytes + w_bytes + b_bytes + o_bytes), 16 * 1024 * 1024),
            48 * 1024 * 1024)
    )

    cost = pl.CostEstimate(
        flops=2 * n_pad * d_pad * d_pad,
        transcendentals=2 * n_pad * d_pad,
        bytes_accessed=grid[0] * (x_bytes + o_bytes) + w_bytes + b_bytes,
    )

    stacked = pl.pallas_call(
        _model_kernel,
        out_shape=jax.ShapeDtypeStruct((2, n_pad, d_pad), jnp.float32),
        grid_spec=pltpu.PrefetchScalarGridSpec(
            num_scalar_prefetch=0,
            grid=grid,
            in_specs=[
                pl.BlockSpec((tile_n, d_pad), lambda i: (i, 0)),   # x row tile
                pl.BlockSpec((d_pad, d_pad), lambda i: (0, 0)),    # weight (resident)
                pl.BlockSpec((1, d_pad), lambda i: (0, 0)),        # bias
            ],
            out_specs=pl.BlockSpec((2, tile_n, d_pad), lambda i: (0, i, 0)),
        ),
        compiler_params=pltpu.CompilerParams(
            dimension_semantics=("parallel",),
            vmem_limit_bytes=vmem_limit,
        ),
        cost_estimate=cost,
    )(x_p, wt_p, b_p)

    # Second torch.stack(tensor) is an identity re-stack; flatten(start_dim=1).
    return stacked[:, :n, :d].reshape(2, n * d)


if __name__ == "__main__":
    root = jax.random.PRNGKey(0)
    key_small, key_big = jax.random.split(root)

    def make_inputs(key, n, d):
        kx, kw, kb = jax.random.split(key, 3)
        x = jax.random.normal(kx, (n, d), dtype=jnp.float32)
        bound = 1.0 / jnp.sqrt(jnp.float32(d))
        w = jax.random.uniform(kw, (d, d), minval=-bound, maxval=bound,
                               dtype=jnp.float32)
        b = jax.random.uniform(kb, (d,), minval=-bound, maxval=bound,
                               dtype=jnp.float32)
        return x, w, b

    def reference(x, w, b):
        y = jnp.tanh(jnp.dot(x, w.T, precision=lax.Precision.HIGHEST) + b)
        return jnp.stack([y, jnp.tanh(x)]).reshape(2, x.shape[0] * x.shape[1])

    fwd = jax.jit(model_forward)

    # 1) module-sized problem: x = torch.randn(2, 2)
    x, w, b = make_inputs(key_small, 2, 2)
    out_small = fwd(x, w, b)
    jax.block_until_ready(out_small)
    assert out_small.shape == (2, 2 * 2)
    assert jnp.allclose(out_small, reference(x, w, b), atol=2e-5, rtol=2e-5)

    # 2) larger problem exercising the N-tiled grid (2 row tiles of 256)
    x, w, b = make_inputs(key_big, 512, 128)
    out_big = fwd(x, w, b)
    jax.block_until_ready(out_big)
    assert out_big.shape == (2, 512 * 128)
    assert jnp.allclose(out_big, reference(x, w, b), atol=2e-5, rtol=2e-5)

    print("KERNEL_OK")
</pallas_src>

<mosaic_0001>
module attributes {stable_mosaic.version = 11 : i64} {
  func.func @_model_kernel(%arg0: i32, %arg1: memref<8x128xf32, #tpu.memory_space<vmem>>, %arg2: memref<128x128xf32, #tpu.memory_space<vmem>>, %arg3: memref<1x128xf32, #tpu.memory_space<vmem>>, %arg4: memref<2x8x128xf32, #tpu.memory_space<vmem>>) attributes {dimension_semantics = [#tpu.dimension_semantics<parallel>], iteration_bounds = array<i64: 1>, scalar_prefetch = 0 : i64, scratch_operands = 0 : i64, tpu.core_type = #tpu.core_type<tc>, window_params = [{transform_indices = @transform_0, window_bounds = array<i64: 8, 128>}, {pipeline_mode = #tpu.pipeline_mode<synchronous>, transform_indices = @transform_1, window_bounds = array<i64: 128, 128>}, {pipeline_mode = #tpu.pipeline_mode<synchronous>, transform_indices = @transform_2, window_bounds = array<i64: 1, 128>}, {transform_indices = @transform_3, window_bounds = array<i64: 2, 8, 128>}]} {
    %c0 = arith.constant 0 : index
    %c0_0 = arith.constant 0 : index
    %0 = vector.load %arg1[%c0, %c0_0] : memref<8x128xf32, #tpu.memory_space<vmem>>, vector<8x128xf32>
    %c0_1 = arith.constant 0 : index
    %c0_2 = arith.constant 0 : index
    %1 = vector.load %arg2[%c0_1, %c0_2] : memref<128x128xf32, #tpu.memory_space<vmem>>, vector<128x128xf32>
    %cst = arith.constant dense<0.000000e+00> : vector<8x128xf32>
    %2 = tpu.matmul %0, %1, %cst {dimension_numbers = #tpu.dot_dimension_numbers<[1], [0], [0], [1], [0, 0, 1, 1], [], []>, precision = #tpu.contract_precision<fp32>} : vector<8x128xf32>, vector<128x128xf32>, vector<8x128xf32> -> vector<8x128xf32>
    %c0_3 = arith.constant 0 : index
    %c0_4 = arith.constant 0 : index
    %3 = vector.load %arg3[%c0_3, %c0_4] : memref<1x128xf32, #tpu.memory_space<vmem>>, vector<1x128xf32>
    %4 = vector.broadcast %3 : vector<1x128xf32> to vector<8x128xf32>
    %5 = arith.addf %2, %4 : vector<8x128xf32>
    %6 = math.tanh %5 : vector<8x128xf32>
    %c0_5 = arith.constant 0 : index
    %c0_6 = arith.constant 0 : index
    %c0_7 = arith.constant 0 : index
    %7 = vector.load %arg4[%c0_5, %c0_6, %c0_7] : memref<2x8x128xf32, #tpu.memory_space<vmem>>, vector<1x8x128xf32>
    %8 = vector.shape_cast %7 : vector<1x8x128xf32> to vector<8x128xf32>
    %9 = vector.shape_cast %6 : vector<8x128xf32> to vector<1x8x128xf32>
    tpu.vector_store %arg4[%c0_5, %c0_6, %c0_7], %9 {strides = array<i32>} : memref<2x8x128xf32, #tpu.memory_space<vmem>>, vector<1x8x128xf32>,
    %10 = math.tanh %0 : vector<8x128xf32>
    %c1 = arith.constant 1 : index
    %c0_8 = arith.constant 0 : index
    %c0_9 = arith.constant 0 : index
    %11 = vector.load %arg4[%c1, %c0_8, %c0_9] : memref<2x8x128xf32, #tpu.memory_space<vmem>>, vector<1x8x128xf32>
    %12 = vector.shape_cast %11 : vector<1x8x128xf32> to vector<8x128xf32>
    %13 = vector.shape_cast %10 : vector<8x128xf32> to vector<1x8x128xf32>
    tpu.vector_store %arg4[%c1, %c0_8, %c0_9], %13 {strides = array<i32>} : memref<2x8x128xf32, #tpu.memory_space<vmem>>, vector<1x8x128xf32>,
    return
  }
  func.func @transform_0(%arg0: i32) -> (i32, i32) {
    %c0_i32 = arith.constant 0 : i32
    %c0_i32_0 = arith.constant 0 : i32
    return %arg0, %c0_i32 : i32, i32
  }
  func.func @transform_1(%arg0: i32) -> (i32, i32) {
    %c0_i32 = arith.constant 0 : i32
    %c0_i32_0 = arith.constant 0 : i32
    %c0_i32_1 = arith.constant 0 : i32
    return %c0_i32, %c0_i32_0 : i32, i32
  }
  func.func @transform_2(%arg0: i32) -> (i32, i32) {
    %c0_i32 = arith.constant 0 : i32
    %c0_i32_0 = arith.constant 0 : i32
    %c0_i32_1 = arith.constant 0 : i32
    return %c0_i32, %c0_i32_0 : i32, i32
  }
  func.func @transform_3(%arg0: i32) -> (i32, i32, i32) {
    %c0_i32 = arith.constant 0 : i32
    %c0_i32_0 = arith.constant 0 : i32
    %c0_i32_1 = arith.constant 0 : i32
    return %c0_i32, %arg0, %c0_i32_0 : i32, i32, i32
  }
}

</mosaic_0001>

<bundles_post_ra>
// kernel: model_forward.1
= control target key start
LH: loop header
LB: loop body
LE: loop exit
PB: predicated region body
PF: predicated region fallthrough
CT: control target
= control target key end

     0   :  { %v1008_v0 = vmov 0.0   ;;  %vm1009_vm0 = vmmov 0   ;;  %s1458_s1 = inlined_call_operand.vmem [shape: f32[128,128], index: 1, kind: input, shape index: {}]   ;;  %s1459_s0 = inlined_call_operand.vmem [shape: f32[8,128], index: 0, kind: input, shape index: {}]   ;;  %s1460_s3 = inlined_call_operand.vmem [shape: f32[2,8,128], index: 3, kind: output, shape index: {}]   ;;  %s1461_s2 = inlined_call_operand.vmem [shape: f32[1,128], index: 2, kind: input, shape index: {}]  }
   0x1   :  { %792 = vmatprep.subr.mxu0 %v1008_v0  ;;  %v30_v1 = vld [vmem:[%s1458_s1 + $0x78] sm:$0xff]  ;;  %v29_v2 = vld [vmem:[%s1458_s1 + $0x70] sm:$0xff]  ;;  %v28_v3 = vld [vmem:[%s1458_s1 + $0x68] sm:$0xff]  ;;  %827 = vmatprep.subr.mxu1 %v1008_v0 }
   0x2   :  { %v1041_v4 = vand.u32 4294901760, %v30_v1  ;;  %v1043_v5 = vand.u32 4294901760, %v29_v2  ;;  %v1045_v6 = vand.u32 4294901760, %v28_v3  ;;  %v27_v7 = vld [vmem:[%s1458_s1 + $0x60] sm:$0xff]  ;;  %v26_v8 = vld [vmem:[%s1458_s1 + $0x58] sm:$0xff]  ;;  %v25_v9 = vld [vmem:[%s1458_s1 + $0x50] sm:$0xff]  ;;  %824 = vmatprep.mubr.msk.f32.mxu0 %vm1009_vm0, %v1008_v0  ;;  %859 = vmatprep.mubr.msk.f32.mxu1 %vm1009_vm0, %v1008_v0 }
   0x3   :  { %v1060_v10 = vand.u32 4294901760, %v27_v7  ;;  %v1062_v11 = vand.u32 4294901760, %v26_v8  ;;  %v1064_v12 = vand.u32 4294901760, %v25_v9  ;;  %v24_v13 = vld [vmem:[%s1458_s1 + $0x48] sm:$0xff]  ;;  %v23_v14 = vld [vmem:[%s1458_s1 + $0x40] sm:$0xff]  ;;  %v22_v19 = vld [vmem:[%s1458_s1 + $0x38] sm:$0xff] }
   0x4   :  { %793 = vmatpush3.msra.mxu0 %v1041_v4  ;;  %v1074_v15 = vsub.f32 %v30_v1, %v1041_v4  ;;  %v1077_v16 = vsub.f32 %v29_v2, %v1043_v5  ;;  %v1079_v17 = vand.u32 4294901760, %v24_v13  ;;  %v1082_v18 = vsub.f32 %v28_v3, %v1045_v6  ;;  %v21_v26 = vld [vmem:[%s1458_s1 + $0x30] sm:$0xff]  ;;  %v20_v36 = vld [vmem:[%s1458_s1 + $0x28] sm:$0xff]  ;;  %v19_v41 = vld [vmem:[%s1458_s1 + $0x20] sm:$0xff] }
   0x5   :  { %794 = vmatprep.subr.mxu0 %v1008_v0  ;;  %v1089_v20 = vsub.f32 %v27_v7, %v1060_v10  ;;  %v1092_v21 = vsub.f32 %v26_v8, %v1062_v11  ;;  %v1098_v25 = vand.u32 4294901760, %v23_v14  ;;  %v1105_v28 = vand.u32 4294901760, %v22_v19  ;;  %v18_v49 = vld [vmem:[%s1458_s1 + $0x18] sm:$0xff]  ;;  %v1162_v50 = vld [vmem:[%s1459_s0] sm:$0xff]  ;;  %v17_v54 = vld [vmem:[%s1458_s1 + $0x10] sm:$0xff] }
   0x6   :  { %795 = vmatpush3.msra.mxu0 %v1043_v5  ;;  %v132_v22 = vand.u32 4294901760, %v1074_v15  ;;  %v139_v23 = vand.u32 4294901760, %v1077_v16  ;;  %v146_v24 = vand.u32 4294901760, %v1082_v18  ;;  %v1109_v30 = vsub.f32 %v25_v9, %v1064_v12  ;;  %v16_v60 = vld [vmem:[%s1458_s1 + $0x8] sm:$0xff]  ;;  %v15_v7 = vld [vmem:[%s1458_s1] sm:$0xff] }
   0x7   :  { %796 = vmatprep.subr.mxu0 %v1008_v0  ;;  %v153_v27 = vand.u32 4294901760, %v1089_v20  ;;  %v160_v29 = vand.u32 4294901760, %v1092_v21  ;;  %v1122_v34 = vsub.f32 %v24_v13, %v1079_v17  ;;  %v1125_v35 = vand.u32 4294901760, %v21_v26 }
   0x8   :  { %797 = vmatpush3.msra.mxu0 %v1045_v6  ;;  %v133_v31 = vsub.f32 %v1074_v15, %v132_v22  ;;  %v140_v32 = vsub.f32 %v1077_v16, %v139_v23  ;;  %v147_v33 = vsub.f32 %v1082_v18, %v146_v24  ;;  %v167_v40 = vand.u32 4294901760, %v1109_v30 }
   0x9   :  { %798 = vmatprep.subr.mxu0 %v1008_v0  ;;  %v154_v39 = vsub.f32 %v1089_v20, %v153_v27  ;;  %v161_v42 = vsub.f32 %v1092_v21, %v160_v29  ;;  %v1143_v43 = vsub.f32 %v23_v14, %v1098_v25  ;;  %v1146_v45 = vand.u32 4294901760, %v20_v36 }
   0xa   :  { %799 = vmatpush3.msra.mxu0 %v1060_v10  ;;  %v134_v37 = vand.u32 4294901760, %v133_v31  ;;  %v141_v38 = vand.u32 4294901760, %v140_v32  ;;  %v148_v44 = vand.u32 4294901760, %v147_v33  ;;  %v174_v46 = vand.u32 4294901760, %v1122_v34 }
   0xb   :  { %800 = vmatprep.subr.mxu0 %v1008_v0  ;;  %v1150_v47 = vsub.f32 %v22_v19, %v1105_v28  ;;  %v1154_v48 = vand.u32 4294901760, %v19_v41  ;;  %v155_v51 = vand.u32 4294901760, %v154_v39  ;;  %v168_v52 = vsub.f32 %v1109_v30, %v167_v40 }
   0xc   :  { %801 = vmatpush3.msra.mxu0 %v1062_v11  ;;  %828 = vmatpush3.msra.mxu1 %v134_v37  ;;  %v181_v53 = vand.u32 4294901760, %v1143_v43  ;;  %v1173_v55 = vsub.f32 %v21_v26, %v1125_v35  ;;  %v162_v56 = vand.u32 4294901760, %v161_v42  ;;  %v175_v58 = vsub.f32 %v1122_v34, %v174_v46 }
   0xd   :  { %802 = vmatprep.subr.mxu0 %v1008_v0  ;;  %829 = vmatprep.subr.mxu1 %v1008_v0  ;;  %v188_v57 = vand.u32 4294901760, %v1150_v47  ;;  %v1182_v59 = vand.u32 4294901760, %v18_v49  ;;  %v1188_v61 = vsub.f32 %v20_v36, %v1146_v45  ;;  %v1191_v62 = vand.u32 4294901760, %v1162_v50 }
   0xe   :  { %803 = vmatpush3.msra.mxu0 %v1064_v12  ;;  %830 = vmatpush3.msra.mxu1 %v141_v38  ;;  %v1195_v63 = vand.u32 4294901760, %v17_v54  ;;  %v169_v1 = vand.u32 4294901760, %v168_v52  ;;  %v182_v2 = vsub.f32 %v1143_v43, %v181_v53  ;;  %v195_v3 = vand.u32 4294901760, %v1173_v55 }
   0xf   :  { %804 = vmatprep.subr.mxu0 %v1008_v0  ;;  %831 = vmatprep.subr.mxu1 %v1008_v0  ;;  %v1206_v8 = vsub.f32 %v19_v41, %v1154_v48  ;;  %v189_v9 = vsub.f32 %v1150_v47, %v188_v57  ;;  %v1213_v13 = vand.u32 4294901760, %v16_v60  ;;  %v176_v14 = vand.u32 4294901760, %v175_v58 }
  0x10   :  { %805 = vmatpush3.msra.mxu0 %v1079_v17  ;;  %832 = vmatpush3.msra.mxu1 %v148_v44  ;;  %v202_v19 = vand.u32 4294901760, %v1188_v61  ;;  %v1219_v26 = vsub.f32 %v1162_v50, %v1191_v62  ;;  %v1222_v31 = vsub.f32 %v18_v49, %v1182_v59  ;;  %v1226_v32 = vand.u32 4294901760, %v15_v7 }
  0x11   :  { %806 = vmatprep.subr.mxu0 %v1008_v0  ;;  %833 = vmatprep.subr.mxu1 %v1008_v0  ;;  %v183_v33 = vand.u32 4294901760, %v182_v2  ;;  %v196_v36 = vsub.f32 %v1173_v55, %v195_v3  ;;  %v209_v37 = vand.u32 4294901760, %v1206_v8  ;;  %v1234_v38 = vsub.f32 %v17_v54, %v1195_v63 }
  0x12   :  { %807 = vmatpush3.msra.mxu0 %v1098_v25  ;;  %834 = vmatpush3.msra.mxu1 %v155_v51  ;;  %v190_v39 = vand.u32 4294901760, %v189_v9  ;;  %v203_v41 = vsub.f32 %v1188_v61, %v202_v19  ;;  %v121_v42 = vand.u32 4294901760, %v1219_v26  ;;  %v216_v44 = vand.u32 4294901760, %v1222_v31 }
  0x13   :  { %808 = vmatprep.subr.mxu0 %v1008_v0  ;;  %835 = vmatprep.subr.mxu1 %v1008_v0  ;;  %v1245_v49 = vsub.f32 %v16_v60, %v1213_v13  ;;  %v197_v51 = vand.u32 4294901760, %v196_v36  ;;  %v210_v52 = vsub.f32 %v1206_v8, %v209_v37  ;;  %v223_v54 = vand.u32 4294901760, %v1234_v38 }
  0x14   :  { %809 = vmatpush3.msra.mxu0 %v1105_v28  ;;  %836 = vmatpush3.msra.mxu1 %v162_v56  ;;  %v1255_v56 = vsub.f32 %v15_v7, %v1226_v32  ;;  %v204_v58 = vand.u32 4294901760, %v203_v41  ;;  %v122_v60 = vsub.f32 %v1219_v26, %v121_v42  ;;  %1004 = vtanh.f32 %v1162_v50 }
  0x15   :  { %810 = vmatprep.subr.mxu0 %v1008_v0  ;;  %837 = vmatprep.subr.mxu1 %v1008_v0  ;;  %v230_v2 = vand.u32 4294901760, %v1245_v49  ;;  %v211_v7 = vand.u32 4294901760, %v210_v52  ;;  %v224_v9 = vsub.f32 %v1234_v38, %v223_v54 }
  0x16   :  { %811 = vmatpush3.msra.mxu0 %v1125_v35  ;;  %838 = vmatpush3.msra.mxu1 %v169_v1  ;;  %v217_v1 = vsub.f32 %v1222_v31, %v216_v44 }
  0x17   :  { %812 = vmatprep.subr.mxu0 %v1008_v0  ;;  %839 = vmatprep.subr.mxu1 %v1008_v0  ;;  %v225_v41 = vand.u32 4294901760, %v224_v9 }
  0x18   :  { %813 = vmatpush3.msra.mxu0 %v1146_v45  ;;  %840 = vmatpush3.msra.mxu1 %v176_v14  ;;  %v237_v14 = vand.u32 4294901760, %v1255_v56  ;;  %v218_v36 = vand.u32 4294901760, %v217_v1 }
  0x19   :  { %814 = vmatprep.subr.mxu0 %v1008_v0  ;;  %841 = vmatprep.subr.mxu1 %v1008_v0 }
  0x1a   :  { %815 = vmatpush3.msra.mxu0 %v1154_v48  ;;  %842 = vmatpush3.msra.mxu1 %v183_v33  ;;  %v123_v33 = vand.u32 4294901760, %v122_v60 }
  0x1b   :  { %816 = vmatprep.subr.mxu0 %v1008_v0  ;;  %843 = vmatprep.subr.mxu1 %v1008_v0 }
  0x1c   :  { %817 = vmatpush3.msra.mxu0 %v1182_v59  ;;  %844 = vmatpush3.msra.mxu1 %v190_v39  ;;  %v231_v39 = vsub.f32 %v1245_v49, %v230_v2 }
  0x1d   :  { %818 = vmatprep.subr.mxu0 %v1008_v0  ;;  %845 = vmatprep.subr.mxu1 %v1008_v0 }
  0x1e   :  { %819 = vmatpush3.msra.mxu0 %v1195_v63  ;;  %846 = vmatpush3.msra.mxu1 %v197_v51  ;;  %v238_v51 = vsub.f32 %v1255_v56, %v237_v14  ;;  %v232_v52 = vand.u32 4294901760, %v231_v39 }
  0x1f   :  { %820 = vmatprep.subr.mxu0 %v1008_v0  ;;  %847 = vmatprep.subr.mxu1 %v1008_v0 }
  0x20   :  { %821 = vmatpush3.msra.mxu0 %v1213_v13  ;;  %848 = vmatpush3.msra.mxu1 %v204_v58  ;;  %v239_v58 = vand.u32 4294901760, %v238_v51 }
  0x21   :  { %822 = vmatprep.subr.mxu0 %v1008_v0  ;;  %849 = vmatprep.subr.mxu1 %v1008_v0 }
  0x22   :  { %823 = vmatpush3.msra.mxu0 %v1226_v32  ;;  %850 = vmatpush3.msra.mxu1 %v211_v7 }
  0x23   :  { %851 = vmatprep.subr.mxu1 %v1008_v0  ;;  %862 = vmatprep.subr.mxu0 %v1008_v0 }
  0x24   :  { %825 = vmatmul.mubr.f32.vlgmr.msra.gmra.mxu0 %v123_v33  ;;  %852 = vmatpush3.msra.mxu1 %v218_v36 }
  0x25   :  { %863 = vmatpush3.msra.mxu0 %v1074_v15  ;;  %853 = vmatprep.subr.mxu1 %v1008_v0 }
  0x26   :  { %864 = vmatprep.subr.mxu0 %v1008_v0  ;;  %854 = vmatpush3.msra.mxu1 %v225_v41 }
  0x27   :  { %865 = vmatpush3.msra.mxu0 %v1077_v16  ;;  %855 = vmatprep.subr.mxu1 %v1008_v0 }
  0x28   :  { %866 = vmatprep.subr.mxu0 %v1008_v0  ;;  %856 = vmatpush3.msra.mxu1 %v232_v52 }
  0x29   :  { %867 = vmatpush3.msra.mxu0 %v1082_v18  ;;  %857 = vmatprep.subr.mxu1 %v1008_v0 }
  0x2a   :  { %868 = vmatprep.subr.mxu0 %v1008_v0  ;;  %858 = vmatpush3.msra.mxu1 %v239_v58 }
  0x2b   :  { %869 = vmatpush3.msra.mxu0 %v1089_v20  ;;  %860 = vmatmul.mubr.f32.vlgmr.msra.gmra.mxu1 %v1191_v62 }
  0x2c   :  { %870 = vmatprep.subr.mxu0 %v1008_v0  ;;  %897 = vmatprep.subr.mxu1 %v1008_v0 }
  0x2d   :  { %871 = vmatpush3.msra.mxu0 %v1092_v21  ;;  %898 = vmatpush3.msra.mxu1 %v1041_v4 }
  0x2e   :  { %872 = vmatprep.subr.mxu0 %v1008_v0  ;;  %899 = vmatprep.subr.mxu1 %v1008_v0 }
  0x2f   :  { %873 = vmatpush3.msra.mxu0 %v1109_v30  ;;  %900 = vmatpush3.msra.mxu1 %v1043_v5 }
  0x30   :  { %874 = vmatprep.subr.mxu0 %v1008_v0  ;;  %901 = vmatprep.subr.mxu1 %v1008_v0 }
  0x31   :  { %875 = vmatpush3.msra.mxu0 %v1122_v34  ;;  %902 = vmatpush3.msra.mxu1 %v1045_v6 }
  0x32   :  { %876 = vmatprep.subr.mxu0 %v1008_v0  ;;  %903 = vmatprep.subr.mxu1 %v1008_v0 }
  0x33   :  { %877 = vmatpush3.msra.mxu0 %v1143_v43  ;;  %904 = vmatpush3.msra.mxu1 %v1060_v10 }
  0x34   :  { %878 = vmatprep.subr.mxu0 %v1008_v0  ;;  %905 = vmatprep.subr.mxu1 %v1008_v0 }
  0x35   :  { %879 = vmatpush3.msra.mxu0 %v1150_v47  ;;  %906 = vmatpush3.msra.mxu1 %v1062_v11 }
  0x36   :  { %880 = vmatprep.subr.mxu0 %v1008_v0  ;;  %907 = vmatprep.subr.mxu1 %v1008_v0 }
  0x37   :  { %881 = vmatpush3.msra.mxu0 %v1173_v55  ;;  %908 = vmatpush3.msra.mxu1 %v1064_v12 }
  0x38   :  { %882 = vmatprep.subr.mxu0 %v1008_v0  ;;  %909 = vmatprep.subr.mxu1 %v1008_v0 }
  0x39   :  { %883 = vmatpush3.msra.mxu0 %v1188_v61  ;;  %910 = vmatpush3.msra.mxu1 %v1079_v17 }
  0x3a   :  { %884 = vmatprep.subr.mxu0 %v1008_v0  ;;  %911 = vmatprep.subr.mxu1 %v1008_v0 }
  0x3b   :  { %885 = vmatpush3.msra.mxu0 %v1206_v8  ;;  %912 = vmatpush3.msra.mxu1 %v1098_v25 }
  0x3c   :  { %886 = vmatprep.subr.mxu0 %v1008_v0  ;;  %913 = vmatprep.subr.mxu1 %v1008_v0 }
  0x3d   :  { %887 = vmatpush3.msra.mxu0 %v1222_v31  ;;  %914 = vmatpush3.msra.mxu1 %v1105_v28 }
  0x3e   :  { %888 = vmatprep.subr.mxu0 %v1008_v0  ;;  %915 = vmatprep.subr.mxu1 %v1008_v0 }
  0x3f   :  { %889 = vmatpush3.msra.mxu0 %v1234_v38  ;;  %916 = vmatpush3.msra.mxu1 %v1125_v35 }
  0x40   :  { %890 = vmatprep.subr.mxu0 %v1008_v0  ;;  %917 = vmatprep.subr.mxu1 %v1008_v0 }
  0x41   :  { %891 = vmatpush3.msra.mxu0 %v1245_v49  ;;  %918 = vmatpush3.msra.mxu1 %v1146_v45 }
  0x42   :  { %892 = vmatprep.subr.mxu0 %v1008_v0  ;;  %919 = vmatprep.subr.mxu1 %v1008_v0 }
  0x43   :  { %893 = vmatpush3.msra.mxu0 %v1255_v56  ;;  %894 = vmatprep.mubr.msk.f32.mxu0 %vm1009_vm0, %v1008_v0 }
  0x44   :  { %920 = vmatpush3.msra.mxu1 %v1154_v48  ;;  %895 = vmatmul.mubr.f32.vlgmr.msra.gmra.mxu0 %v1219_v26 }
  0x45   :  { %921 = vmatprep.subr.mxu1 %v1008_v0  ;;  %932 = vmatprep.subr.mxu0 %v1008_v0 }
  0x46   :  { %922 = vmatpush3.msra.mxu1 %v1182_v59  ;;  %933 = vmatpush3.msra.mxu0 %v132_v22 }
  0x47   :  { %923 = vmatprep.subr.mxu1 %v1008_v0  ;;  %934 = vmatprep.subr.mxu0 %v1008_v0 }
  0x48   :  { %924 = vmatpush3.msra.mxu1 %v1195_v63  ;;  %935 = vmatpush3.msra.mxu0 %v139_v23 }
  0x49   :  { %925 = vmatprep.subr.mxu1 %v1008_v0  ;;  %936 = vmatprep.subr.mxu0 %v1008_v0 }
  0x4a   :  { %926 = vmatpush3.msra.mxu1 %v1213_v13  ;;  %937 = vmatpush3.msra.mxu0 %v146_v24 }
  0x4b   :  { %927 = vmatprep.subr.mxu1 %v1008_v0  ;;  %938 = vmatprep.subr.mxu0 %v1008_v0 }
  0x4c   :  { %928 = vmatpush3.msra.mxu1 %v1226_v32  ;;  %929 = vmatprep.mubr.msk.f32.mxu1 %vm1009_vm0, %v1008_v0 }
  0x4d   :  { %939 = vmatpush3.msra.mxu0 %v153_v27  ;;  %930 = vmatmul.mubr.f32.vlgmr.msra.gmra.mxu1 %v121_v42 }
  0x4e   :  { %940 = vmatprep.subr.mxu0 %v1008_v0  ;;  %967 = vmatprep.subr.mxu1 %v1008_v0 }
  0x4f   :  { %941 = vmatpush3.msra.mxu0 %v160_v29  ;;  %968 = vmatpush3.msra.mxu1 %v1041_v4  ;;  %v1005_v4 = vpop.eup %1004 }
  0x50   :  { %942 = vmatprep.subr.mxu0 %v1008_v0  ;;  %969 = vmatprep.subr.mxu1 %v1008_v0  ;;  %689 = vst [vmem:[%s1460_s3 + $0x8] sm:$0xff] %v1005_v4 }
  0x51   :  { %943 = vmatpush3.msra.mxu0 %v167_v40  ;;  %970 = vmatpush3.msra.mxu1 %v1043_v5 }
  0x52   :  { %944 = vmatprep.subr.mxu0 %v1008_v0  ;;  %971 = vmatprep.subr.mxu1 %v1008_v0 }
  0x53   :  { %945 = vmatpush3.msra.mxu0 %v174_v46  ;;  %972 = vmatpush3.msra.mxu1 %v1045_v6 }
  0x54   :  { %946 = vmatprep.subr.mxu0 %v1008_v0  ;;  %973 = vmatprep.subr.mxu1 %v1008_v0 }
  0x55   :  { %947 = vmatpush3.msra.mxu0 %v181_v53  ;;  %974 = vmatpush3.msra.mxu1 %v1060_v10 }
  0x56   :  { %948 = vmatprep.subr.mxu0 %v1008_v0  ;;  %975 = vmatprep.subr.mxu1 %v1008_v0 }
  0x57   :  { %949 = vmatpush3.msra.mxu0 %v188_v57  ;;  %976 = vmatpush3.msra.mxu1 %v1062_v11 }
  0x58   :  { %950 = vmatprep.subr.mxu0 %v1008_v0  ;;  %977 = vmatprep.subr.mxu1 %v1008_v0 }
  0x59   :  { %951 = vmatpush3.msra.mxu0 %v195_v3  ;;  %978 = vmatpush3.msra.mxu1 %v1064_v12 }
  0x5a   :  { %952 = vmatprep.subr.mxu0 %v1008_v0  ;;  %979 = vmatprep.subr.mxu1 %v1008_v0 }
  0x5b   :  { %953 = vmatpush3.msra.mxu0 %v202_v19  ;;  %980 = vmatpush3.msra.mxu1 %v1079_v17 }
  0x5c   :  { %954 = vmatprep.subr.mxu0 %v1008_v0  ;;  %981 = vmatprep.subr.mxu1 %v1008_v0 }
  0x5d   :  { %955 = vmatpush3.msra.mxu0 %v209_v37  ;;  %982 = vmatpush3.msra.mxu1 %v1098_v25 }
  0x5e   :  { %956 = vmatprep.subr.mxu0 %v1008_v0  ;;  %983 = vmatprep.subr.mxu1 %v1008_v0 }
  0x5f   :  { %957 = vmatpush3.msra.mxu0 %v216_v44  ;;  %984 = vmatpush3.msra.mxu1 %v1105_v28 }
  0x60   :  { %958 = vmatprep.subr.mxu0 %v1008_v0  ;;  %985 = vmatprep.subr.mxu1 %v1008_v0 }
  0x61   :  { %959 = vmatpush3.msra.mxu0 %v223_v54  ;;  %986 = vmatpush3.msra.mxu1 %v1125_v35 }
  0x62   :  { %960 = vmatprep.subr.mxu0 %v1008_v0  ;;  %987 = vmatprep.subr.mxu1 %v1008_v0 }
  0x63   :  { %961 = vmatpush3.msra.mxu0 %v230_v2  ;;  %988 = vmatpush3.msra.mxu1 %v1146_v45 }
  0x64   :  { %962 = vmatprep.subr.mxu0 %v1008_v0  ;;  %989 = vmatprep.subr.mxu1 %v1008_v0 }
  0x65   :  { %963 = vmatpush3.msra.mxu0 %v237_v14  ;;  %964 = vmatprep.mubr.msk.f32.mxu0 %vm1009_vm0, %v1008_v0 }
  0x66   :  { %990 = vmatpush3.msra.mxu1 %v1154_v48  ;;  %965 = vmatmul.mubr.f32.vlgmr.msra.gmra.mxu0 %v1191_v62 }
  0x67   :  { %991 = vmatprep.subr.mxu1 %v1008_v0  ;;  %999 = vmatprep.mubr.msk.f32.mxu1 %vm1009_vm0, %v1008_v0 }
  0x68   :  { %992 = vmatpush3.msra.mxu1 %v1182_v59 }
  0x69   :  { %993 = vmatprep.subr.mxu1 %v1008_v0 }
  0x6a   :  { %994 = vmatpush3.msra.mxu1 %v1195_v63 }
  0x6b   :  { %995 = vmatprep.subr.mxu1 %v1008_v0 }
  0x6c   :  { %996 = vmatpush3.msra.mxu1 %v1213_v13 }
  0x6d   :  { %997 = vmatprep.subr.mxu1 %v1008_v0  ;;  %v688_v0 = vld [vmem:[%s1461_s2] ss:$0 sm:$0xff] }
  0x6e   :  { %998 = vmatpush3.msra.mxu1 %v1226_v32 }
  0x6f   :  { %1000 = vmatmul.mubr.f32.vlgmr.msra.gmra.mxu1 %v1191_v62 }
  0xe4   :  { %v125_v5 = vpop.f32.mrf.mxu0 }
  0xe5   :  { %v126_v18 = vadd.f32 %v688_v0, %v125_v5 }
  0xe6   :  { %v826_v6 = vpop.f32.mrf.mxu0 }
  0xeb   :  { %v276_v10 = vpop.f32.mrf.mxu1 }
  0xec   :  { %v277_v21 = vadd.f32 %v276_v10, %v126_v18 }
  0xed   :  { %v861_v11 = vpop.f32.mrf.mxu1 }
 0x104   :  { %v380_v12 = vpop.f32.mrf.mxu0 }
 0x105   :  { %v381_v23 = vadd.f32 %v380_v12, %v277_v21 }
 0x106   :  { %v896_v15 = vpop.f32.mrf.mxu0 }
 0x10d   :  { %v469_v16 = vpop.f32.mrf.mxu1 }
 0x10e   :  { %v470_v24 = vadd.f32 %v469_v16, %v381_v23 }
 0x10f   :  { %v931_v17 = vpop.f32.mrf.mxu1 }
 0x126   :  { %v588_v20 = vpop.f32.mrf.mxu0 }
 0x127   :  { %v589_v25 = vadd.f32 %v588_v20, %v470_v24 }
 0x128   :  { %v966_v22 = vpop.f32.mrf.mxu0 }
 0x12f   :  { %v675_v27 = vpop.f32.mrf.mxu1 }
 0x130   :  { %v676_v28 = vadd.f32 %v675_v27, %v589_v25 }
 0x131   :  { %v1001_v29 = vpop.f32.mrf.mxu1 }
 0x132   :  { %1006 = vtanh.f32 %v676_v28 }
 0x13f   :  { %v1007_v30 = vpop.eup %1006 }
 0x140   :  { %680 = vst [vmem:[%s1460_s3] sm:$0xff] %v1007_v30 }

</bundles_post_ra>
